<compile_context>
chip_gen: v7x
topology: tpu7x:2x2x1
jax: 0.10.0
libtpu: 0.0.40
codegen_flags: <defaults>
</compile_context>

<pallas_src>
import functools

import jax
import jax.numpy as jnp
from jax.experimental import pallas as pl
from jax.experimental.pallas import tpu as pltpu


def _cdiv(a: int, b: int) -> int:
    return (a + b - 1) // b


def _round_up(x: int, m: int) -> int:
    return _cdiv(x, m) * m


def _sublane(dtype) -> int:
    # Min second-to-last-dim tiling for the dtype (f32: 8, bf16: 16, int8/fp8: 32).
    return {4: 8, 2: 16, 1: 32}.get(jnp.dtype(dtype).itemsize, 8)


def _footprint_bytes(tb: int, tn: int, tk: int, in_bytes: int, out_bytes: int) -> int:
    """Double-buffered VMEM working set of one grid step."""
    return (
        2 * (tb * tk + tk * tn) * in_bytes   # x tile + w tile, double buffered
        + 2 * tb * tn * out_bytes            # output tile, double buffered
        + 2 * tn * 4                         # bias row (f32), double buffered
        + tb * tn * 4                        # f32 accumulator scratch
    )


def _linear_kernel(x_ref, w_ref, b_ref, o_ref, acc_ref):
    # x_ref: (TB, TK)  w_ref: (TK, TN)  b_ref: (1, TN)  o_ref: (TB, TN)
    # acc_ref: (TB, TN) f32 scratch.  K reduction runs over the LAST grid axis.
    k = pl.program_id(2)

    @pl.when(k == 0)
    def _():
        acc_ref[...] = jnp.zeros_like(acc_ref)

    acc_ref[...] += jnp.dot(
        x_ref[...], w_ref[...], preferred_element_type=jnp.float32
    )

    @pl.when(k == pl.num_programs(2) - 1)
    def _():
        o_ref[...] = (acc_ref[...] + b_ref[...].astype(jnp.float32)).astype(o_ref.dtype)


@functools.partial(jax.jit, static_argnames=("item_dim", "block_b", "tn", "tk"))
def _ssl_forward(state, w_t, b2, *, item_dim, block_b, tn, tk):
    B, state_dim = state.shape
    K_pad, N_pad = w_t.shape
    in_dtype = w_t.dtype
    in_bytes = jnp.dtype(in_dtype).itemsize
    out_dtype = state.dtype
    out_bytes = jnp.dtype(out_dtype).itemsize
    sub = _sublane(in_dtype)

    # Balanced batch tile (avoids the old min()/round_up near-2x padding blow-up
    # on awkward batch sizes) aligned to the dtype's sublane multiple.
    nb = _cdiv(B, block_b)
    tb = _round_up(_cdiv(B, nb), sub)
    B_pad = _round_up(B, tb)

    x = state.astype(in_dtype)
    if (B_pad, K_pad) != (B, state_dim):
        # Exact zero padding: extra K columns contribute nothing to the dot.
        x = jnp.pad(x, ((0, B_pad - B), (0, K_pad - state_dim)))

    grid = (N_pad // tn, B_pad // tb, K_pad // tk)

    fp = _footprint_bytes(tb, tn, tk, in_bytes, out_bytes)
    vmem_limit = min(64 * 1024 * 1024, max(32 * 1024 * 1024, int(fp * 1.5)))

    cost = pl.CostEstimate(
        flops=2 * B_pad * N_pad * K_pad,
        transcendentals=0,
        bytes_accessed=(
            B_pad * K_pad * in_bytes        # activations
            + K_pad * N_pad * in_bytes      # weight (read once when K resident)
            + B_pad * N_pad * out_bytes     # output
        ),
    )

    out = pl.pallas_call(
        _linear_kernel,
        out_shape=jax.ShapeDtypeStruct((B_pad, N_pad), out_dtype),
        grid=grid,
        in_specs=[
            # activations: vary on (b, k); re-streamed at most once per N tile
            pl.BlockSpec((tb, tk), lambda n, b, k: (b, k)),
            # weight in (K_pad, N_pad) layout: constant across the batch axis,
            # so with K resident (single K tile) it is DMA'd exactly once.
            pl.BlockSpec((tk, tn), lambda n, b, k: (k, n)),
            # bias: one lane-dense row per N tile
            pl.BlockSpec((1, tn), lambda n, b, k: (0, n)),
        ],
        out_specs=pl.BlockSpec((tb, tn), lambda n, b, k: (b, n)),
        scratch_shapes=[pltpu.VMEM((tb, tn), jnp.float32)],
        compiler_params=pltpu.CompilerParams(
            # N outer (weight sharding on megacore), B middle, K reduction last.
            dimension_semantics=("parallel", "parallel", "arbitrary"),
            vmem_limit_bytes=vmem_limit,
        ),
        cost_estimate=cost,
    )(x, w_t, b2)

    # Strip padding back to the module's logical output shape.
    return out[:B, :item_dim]


class SSLModelPallas:
    """Pallas TPU implementation of SSLModel.forward (a single nn.Linear)."""

    def __init__(self, weight, bias, *, block_b: int = 512, block_n: int = 512,
                 compute_dtype=None,
                 vmem_working_set_budget: int = 24 * 1024 * 1024):
        item_dim, state_dim = weight.shape
        assert bias.shape == (item_dim,)
        self.item_dim = int(item_dim)

        in_dtype = jnp.dtype(compute_dtype) if compute_dtype is not None else jnp.dtype(weight.dtype)
        in_bytes = in_dtype.itemsize
        sub = _sublane(in_dtype)
        self.block_b = _round_up(max(int(block_b), sub), sub)

        # ---- N (item_dim) tile: balanced, multiple of 128 -------------------
        n128 = _round_up(self.item_dim, 128)
        n_tiles = _cdiv(n128, max(int(block_n), 128))
        self.tn = _round_up(_cdiv(n128, n_tiles), 128)
        n_pad = self.tn * _cdiv(n128, self.tn)

        # ---- K (state_dim) tile: largest multiple of 128 whose double-buffered
        #      working set fits the cross-generation VMEM budget.  K fully
        #      resident when it fits -> weight DMA'd exactly once per forward.
        k128 = _round_up(int(state_dim), 128)
        nk = 1
        while True:
            tk = _round_up(_cdiv(k128, nk), 128)
            if (_footprint_bytes(self.block_b, self.tn, tk, in_bytes, 4)
                    <= vmem_working_set_budget) or tk == 128:
                break
            nk += 1
        self.tk = tk
        k_pad = self.tk * _cdiv(k128, self.tk)

        # ---- one-time weight/bias prep (hoisted out of the per-call path):
        #      pad -> transpose to (K_pad, N_pad) -> cast to compute dtype.
        w = jnp.asarray(weight)
        if (n_pad, k_pad) != (item_dim, state_dim):
            w = jnp.pad(w, ((0, n_pad - item_dim), (0, k_pad - state_dim)))
        self.w_t = jnp.asarray(w.T, dtype=in_dtype)          # (K_pad, N_pad)

        b = jnp.asarray(bias, dtype=jnp.float32)
        if n_pad != item_dim:
            b = jnp.pad(b, (0, n_pad - item_dim))
        self.b2 = b.reshape(1, n_pad)                        # (1, N_pad)

    def __call__(self, state):
        return _ssl_forward(
            state, self.w_t, self.b2,
            item_dim=self.item_dim, block_b=self.block_b,
            tn=self.tn, tk=self.tk,
        )


if __name__ == "__main__":
    # Small shapes consistent with the module: batch=8, state_dim=32, item_dim=16.
    # (At these toy sizes plain XLA fusion would beat any custom call; the kernel
    #  is structured for the scaled-up shapes the tiling targets.)
    B, state_dim, item_dim = 8, 32, 16

    key = jax.random.PRNGKey(0)
    k_x, k_w, k_b = jax.random.split(key, 3)

    bound = 1.0 / (state_dim ** 0.5)
    weight = jax.random.uniform(k_w, (item_dim, state_dim), jnp.float32, -bound, bound)
    bias = jax.random.uniform(k_b, (item_dim,), jnp.float32, -bound, bound)
    state = jax.random.normal(k_x, (B, state_dim), jnp.float32)

    model = SSLModelPallas(weight, bias)   # one-time pad/transpose of params
    out = jax.block_until_ready(model(state))

    # Correctness check against a plain-JAX reference of the PyTorch forward.
    ref = state @ weight.T + bias
    assert out.shape == (B, item_dim), out.shape
    assert out.dtype == state.dtype
    assert jnp.allclose(out, ref, atol=1e-5, rtol=1e-5)

    print("KERNEL_OK")
</pallas_src>

<mosaic_0001>
module attributes {stable_mosaic.version = 11 : i64} {
  func.func @_linear_kernel(%arg0: i32, %arg1: i32, %arg2: i32, %arg3: memref<8x128xf32, #tpu.memory_space<vmem>>, %arg4: memref<128x128xf32, #tpu.memory_space<vmem>>, %arg5: memref<1x128xf32, #tpu.memory_space<vmem>>, %arg6: memref<8x128xf32, #tpu.memory_space<vmem>>, %arg7: memref<8x128xf32, #tpu.memory_space<vmem>>) attributes {dimension_semantics = [#tpu.dimension_semantics<parallel>, #tpu.dimension_semantics<parallel>, #tpu.dimension_semantics<arbitrary>], iteration_bounds = array<i64: 1, 1, 1>, scalar_prefetch = 0 : i64, scratch_operands = 1 : i64, tpu.core_type = #tpu.core_type<tc>, window_params = [{transform_indices = @transform_0, window_bounds = array<i64: 8, 128>}, {transform_indices = @transform_1, window_bounds = array<i64: 128, 128>}, {transform_indices = @transform_2, window_bounds = array<i64: 1, 128>}, {transform_indices = @transform_3, window_bounds = array<i64: 8, 128>}]} {
    %c0_i32 = arith.constant 0 : i32
    %0 = arith.cmpi eq, %arg2, %c0_i32 : i32
    %1 = arith.extui %0 : i1 to i32
    %c0_i32_0 = arith.constant 0 : i32
    %2 = arith.cmpi ne, %1, %c0_i32_0 : i32
    scf.if %2 {
      %cst_10 = arith.constant 0.000000e+00 : f32
      %12 = vector.broadcast %cst_10 : f32 to vector<8x128xf32>
      %c0_11 = arith.constant 0 : index
      %c0_12 = arith.constant 0 : index
      %13 = vector.load %arg7[%c0_11, %c0_12] : memref<8x128xf32, #tpu.memory_space<vmem>>, vector<8x128xf32>
      tpu.vector_store %arg7[%c0_11, %c0_12], %12 {strides = array<i32>} : memref<8x128xf32, #tpu.memory_space<vmem>>, vector<8x128xf32>,
    } else {
    }
    %c0 = arith.constant 0 : index
    %c0_1 = arith.constant 0 : index
    %3 = vector.load %arg7[%c0, %c0_1] : memref<8x128xf32, #tpu.memory_space<vmem>>, vector<8x128xf32>
    %c0_2 = arith.constant 0 : index
    %c0_3 = arith.constant 0 : index
    %4 = vector.load %arg3[%c0_2, %c0_3] : memref<8x128xf32, #tpu.memory_space<vmem>>, vector<8x128xf32>
    %c0_4 = arith.constant 0 : index
    %c0_5 = arith.constant 0 : index
    %5 = vector.load %arg4[%c0_4, %c0_5] : memref<128x128xf32, #tpu.memory_space<vmem>>, vector<128x128xf32>
    %cst = arith.constant dense<0.000000e+00> : vector<8x128xf32>
    %6 = tpu.matmul %4, %5, %cst {dimension_numbers = #tpu.dot_dimension_numbers<[1], [0], [0], [1], [0, 0, 1, 1], [], []>} : vector<8x128xf32>, vector<128x128xf32>, vector<8x128xf32> -> vector<8x128xf32>
    %7 = arith.addf %3, %6 : vector<8x128xf32>
    %c0_6 = arith.constant 0 : index
    %c0_7 = arith.constant 0 : index
    %8 = vector.load %arg7[%c0_6, %c0_7] : memref<8x128xf32, #tpu.memory_space<vmem>>, vector<8x128xf32>
    tpu.vector_store %arg7[%c0_6, %c0_7], %7 {strides = array<i32>} : memref<8x128xf32, #tpu.memory_space<vmem>>, vector<8x128xf32>,
    %c0_i32_8 = arith.constant 0 : i32
    %9 = arith.cmpi eq, %arg2, %c0_i32_8 : i32
    %10 = arith.extui %9 : i1 to i32
    %c0_i32_9 = arith.constant 0 : i32
    %11 = arith.cmpi ne, %10, %c0_i32_9 : i32
    scf.if %11 {
      %c0_10 = arith.constant 0 : index
      %c0_11 = arith.constant 0 : index
      %12 = vector.load %arg7[%c0_10, %c0_11] : memref<8x128xf32, #tpu.memory_space<vmem>>, vector<8x128xf32>
      %c0_12 = arith.constant 0 : index
      %c0_13 = arith.constant 0 : index
      %13 = vector.load %arg5[%c0_12, %c0_13] : memref<1x128xf32, #tpu.memory_space<vmem>>, vector<1x128xf32>
      %14 = vector.broadcast %13 : vector<1x128xf32> to vector<8x128xf32>
      %15 = arith.addf %12, %14 : vector<8x128xf32>
      %c0_14 = arith.constant 0 : index
      %c0_15 = arith.constant 0 : index
      %16 = vector.load %arg6[%c0_14, %c0_15] : memref<8x128xf32, #tpu.memory_space<vmem>>, vector<8x128xf32>
      tpu.vector_store %arg6[%c0_14, %c0_15], %15 {strides = array<i32>} : memref<8x128xf32, #tpu.memory_space<vmem>>, vector<8x128xf32>,
    } else {
    }
    return
  }
  func.func @transform_0(%arg0: i32, %arg1: i32, %arg2: i32) -> (i32, i32) {
    %c0_i32 = arith.constant 0 : i32
    return %arg1, %arg2 : i32, i32
  }
  func.func @transform_1(%arg0: i32, %arg1: i32, %arg2: i32) -> (i32, i32) {
    %c0_i32 = arith.constant 0 : i32
    return %arg2, %arg0 : i32, i32
  }
  func.func @transform_2(%arg0: i32, %arg1: i32, %arg2: i32) -> (i32, i32) {
    %c0_i32 = arith.constant 0 : i32
    %c0_i32_0 = arith.constant 0 : i32
    return %c0_i32, %arg0 : i32, i32
  }
  func.func @transform_3(%arg0: i32, %arg1: i32, %arg2: i32) -> (i32, i32) {
    %c0_i32 = arith.constant 0 : i32
    return %arg1, %arg0 : i32, i32
  }
}

</mosaic_0001>

<bundles_post_ra>
// kernel: _ssl_forward.1
= control target key start
LH: loop header
LB: loop body
LE: loop exit
PB: predicated region body
PF: predicated region fallthrough
CT: control target
= control target key end

     0   :  { %8 = vsyncpa [#allocation4], 0  ;;  %s341_s0 = inlined_call_operand.vmem [shape: f32[8,128], index: 0, kind: input, shape index: {}]   ;;  %s342_s1 = inlined_call_operand.hbm [shape: f32[128,128], index: 1, kind: input, shape index: {}]   ;;  %s343_s2 = inlined_call_operand.vmem [shape: f32[1,128], index: 2, kind: input, shape index: {}]   ;;  %s344_s3 = inlined_call_operand.hbm [shape: f32[8,128], index: 3, kind: output, shape index: {}]  }
   0x1   :  { %9 = vsyncpa [#allocation5], 0  ;;  %s284_s12 = smov [#allocation3]   ;;  %s236_s16 = scalar_lea.hbm %s342_s1, 2048 }
   0x2   :  { %s17_s13 = sshll.u32 %s284_s12, 4  ;;  %p237_p0 = scmp.ne.s32.totalorder %s342_s1, %s236_s16  ;;  %s18_s13 = int_to_ptr.vmem [resolvable:$true] %s17_s13 }
   0x3   :  { %p240_p1 = scmp.lt.u32.totalorder %s236_s16, %s342_s1 }
   0x5   :  { %p242_p2 = pnand %p240_p1, %p237_p0 }
   0x7   :  { %245 = shalt.err (!%p242_p2)
}
   0x8   :  { %s246_s21 = scalar_lea.vmem %s18_s13, 2048  ;;  %p251_p4 = scmp.lt.s32.totalorder %s18_s13, %s18_s13 }
   0x9   :  { %p247_p3 = scmp.ne.s32.totalorder %s18_s13, %s246_s21  ;;  %p252_p5 = scmp.lt.s32.totalorder %s246_s21, %s246_s21 }
   0xb   :  { %p253_p6 = por %p252_p5, %p251_p4 }
   0xd   :  { %p254_p7 = pnand %p253_p6, %p247_p3 }
   0xf   :  { %257 = shalt.err (!%p254_p7)
}
  0x10   :  { %s285_s22 = smov 128   ;;  %s286_s23 = smov 8  }
  0x11   :  { %23 = dma.hbm_to_vmem [thread:$0]  %s342_s1, 2048, %s18_s13, [#allocation4], %s285_s22, %s285_s22, %s286_s23  }
  0x12   :  { %280 = dma.done.wait [#allocation4], 2048  }
  0x13   :  { %281 = vsyncadd [#allocation4], 4294965248  ;;  %v287_v0 = vmov 0.0|0.0   ;;  %vm288_vm0 = vmmov 0   ;;  %v289_v1 = vmov 0.0   ;;  %v36_v2 = vld [vmem:[#allocation3] sm:$0xff] }
  0x14   :  { %205 = vmatprep.subr.bf16.mxu0 %v287_v0  ;;  %202 = vmatprep.mubr.msk.f32.mxu0 %vm288_vm0, %v289_v1  ;;  %v37_v3 = vld [vmem:[#allocation3 + $0x8] sm:$0xff]  ;;  %v38_v4 = vld [vmem:[#allocation3 + $0x10] sm:$0xff]  ;;  %v39_v6 = vld [vmem:[#allocation3 + $0x18] sm:$0xff]  ;;  %s290_s29 = smov [#allocation6]  }
  0x15   :  { %v206_v5 = vpack.c.bf16 %v37_v3, %v36_v2  ;;  %v209_v7 = vpack.c.bf16 %v39_v6, %v38_v4  ;;  %v40_v8 = vld [vmem:[#allocation3 + $0x20] sm:$0xff]  ;;  %v41_v9 = vld [vmem:[#allocation3 + $0x28] sm:$0xff]  ;;  %v42_v11 = vld [vmem:[#allocation3 + $0x30] sm:$0xff]  ;;  %s143_s30 = sshll.u32 %s290_s29, 4  ;;  %s144_s30 = int_to_ptr.vmem [resolvable:$true] %s143_s30 }
  0x16   :  { %v212_v10 = vpack.c.bf16 %v41_v9, %v40_v8  ;;  %v43_v12 = vld [vmem:[#allocation3 + $0x38] sm:$0xff]  ;;  %v44_v14 = vld [vmem:[#allocation3 + $0x40] sm:$0xff]  ;;  %v45_v15 = vld [vmem:[#allocation3 + $0x48] sm:$0xff]  ;;  %s258_s4 = scalar_lea.vmem %s144_s30, 128  ;;  %p263_p9 = scmp.lt.s32.totalorder %s144_s30, %s144_s30 }
  0x17   :  { %207 = vmatpush3.bf16.msra.mxu0 %v206_v5  ;;  %v215_v13 = vpack.c.bf16 %v43_v12, %v42_v11  ;;  %v218_v16 = vpack.c.bf16 %v45_v15, %v44_v14  ;;  %v46_v17 = vld [vmem:[#allocation3 + $0x50] sm:$0xff]  ;;  %v47_v18 = vld [vmem:[#allocation3 + $0x58] sm:$0xff]  ;;  %v48_v20 = vld [vmem:[#allocation3 + $0x60] sm:$0xff]  ;;  %p259_p8 = scmp.ne.s32.totalorder %s144_s30, %s258_s4  ;;  %p264_p10 = scmp.lt.s32.totalorder %s258_s4, %s258_s4 }
  0x18   :  { %208 = vmatprep.subr.bf16.mxu0 %v287_v0  ;;  %v221_v19 = vpack.c.bf16 %v47_v18, %v46_v17  ;;  %v49_v21 = vld [vmem:[#allocation3 + $0x68] sm:$0xff]  ;;  %v50_v23 = vld [vmem:[#allocation3 + $0x70] sm:$0xff]  ;;  %v51_v24 = vld [vmem:[#allocation3 + $0x78] sm:$0xff] }
  0x19   :  { %v224_v22 = vpack.c.bf16 %v49_v21, %v48_v20  ;;  %v227_v25 = vpack.c.bf16 %v51_v24, %v50_v23  ;;  %v35_v26 = vld [vmem:[%s341_s0] sm:$0xff]  ;;  %p265_p11 = por %p264_p10, %p263_p9 }
  0x1a   :  { %v152_v27 = vld [vmem:[%s343_s2] ss:$0 sm:$0xff] }
  0x1b   :  { %210 = vmatpush3.bf16.msra.mxu0 %v209_v7  ;;  %p266_p12 = pnand %p265_p11, %p259_p8 }
  0x1c   :  { %211 = vmatprep.subr.bf16.mxu0 %v287_v0 }
  0x1f   :  { %213 = vmatpush3.bf16.msra.mxu0 %v212_v10 }
  0x20   :  { %214 = vmatprep.subr.bf16.mxu0 %v287_v0 }
  0x23   :  { %216 = vmatpush3.bf16.msra.mxu0 %v215_v13 }
  0x24   :  { %217 = vmatprep.subr.bf16.mxu0 %v287_v0 }
  0x27   :  { %219 = vmatpush3.bf16.msra.mxu0 %v218_v16 }
  0x28   :  { %220 = vmatprep.subr.bf16.mxu0 %v287_v0 }
  0x2b   :  { %222 = vmatpush3.bf16.msra.mxu0 %v221_v19 }
  0x2c   :  { %223 = vmatprep.subr.bf16.mxu0 %v287_v0 }
  0x2f   :  { %225 = vmatpush3.bf16.msra.mxu0 %v224_v22 }
  0x30   :  { %226 = vmatprep.subr.bf16.mxu0 %v287_v0 }
  0x33   :  { %228 = vmatpush3.bf16.msra.mxu0 %v227_v25 }
  0x36   :  { %203 = vmatmul.mubr.f32.vlgmr.msra.gmra.mrb[0].mxu0 %v35_v26 }
 0x109   :  { %v118_v28 = vpop.f32.mrb[0].mxu0 }
 0x10a   :  { %v135_v29 = vadd.f32 %v152_v27, %v118_v28  ;;  %v204_v30 = vpop.f32.mrb[1].mxu0 }
 0x10c   :  { %136 = vst [vmem:[#allocation6] sm:$0xff] %v135_v29 }
 0x10d   :  { %269 = shalt.err (!%p266_p12)
}
 0x10e   :  { %s270_s6 = scalar_lea.hbm %s344_s3, 128 }
 0x10f   :  { %p271_p13 = scmp.ne.s32.totalorder %s344_s3, %s270_s6  ;;  %p274_p0 = scmp.lt.u32.totalorder %s270_s6, %s344_s3 }
 0x111   :  { %p276_p1 = pnand %p274_p0, %p271_p13 }
 0x113   :  { %279 = shalt.err (!%p276_p1)
}
 0x114   :  { %146 = dma.vmem_to_hbm [thread:$0]  %s144_s30, 128, %s344_s3, [#allocation5]  }
 0x115   :  { %282 = dma.done.wait [#allocation5], 128  }
 0x116   :  { %283 = vsyncadd [#allocation5], 4294967168 }
 0x117   :  { %150 = vsyncpa [#allocation4], 1 }
 0x118   :  { %151 = vsyncpa [#allocation5], 1 }

</bundles_post_ra>
